<compile_context>
chip_gen: v5e
topology: v5e:2x2
jax: 0.10.0
libtpu: 0.0.40
codegen_flags: <defaults>
</compile_context>

<pallas_src>
import functools

import numpy as np
import jax
import jax.numpy as jnp
from jax.experimental import pallas as pl
from jax.experimental.pallas import tpu as pltpu


def round_up(x, m):
    return (x + m - 1) // m * m


# ------------------------- device-derived parameters ------------------------

_VMEM_LIMIT = None


def vmem_limit_bytes():
    """Scoped-VMEM budget ~45% of the physical per-core VMEM (capped 96 MiB).
    v5e/v6e: ~57 MiB of 128 MiB;  v7x: ~28 MiB of 64 MiB."""
    global _VMEM_LIMIT
    if _VMEM_LIMIT is None:
        cap = 128 * 1024 * 1024
        try:
            cap = int(getattr(pltpu.get_tpu_info(), "vmem_capacity_bytes", cap))
        except Exception:
            pass
        _VMEM_LIMIT = min(int(0.45 * cap), 96 * 1024 * 1024)
    return _VMEM_LIMIT


def pick_tn(n, candidates=(256, 128, 64, 32, 16, 8)):
    """Node-tile size: minimize padded rows, prefer >= 2 grid steps (v7x has
    two TensorCores), then the largest tile (amortizes ~0.35us/step)."""
    n8 = round_up(max(n, 8), 8)
    best_tn, best_key = None, None
    for tn in candidates:
        if tn > n8:
            continue
        n_p = round_up(n8, tn)
        steps = n_p // tn
        key = (n_p - n8, 0 if steps >= 2 else 1, -tn)
        if best_key is None or key < best_key:
            best_tn, best_key = tn, key
    return best_tn if best_tn is not None else 8


def sorting_network(n):
    """Batcher odd-even mergesort comparator pairs for n wires (ascending).
    Generated for the next power of two; comparators touching virtual wires
    (>= n, conceptually +inf) are dropped."""
    m = 1
    while m < n:
        m *= 2
    pairs = []
    p = 1
    while p < m:
        k = p
        while k >= 1:
            for j in range(k % p, m - k, 2 * k):
                for i in range(k):
                    a, b = i + j, i + j + k
                    if (a // (2 * p)) == (b // (2 * p)) and b < n:
                        pairs.append((a, b))
            k //= 2
        p *= 2
    if n <= 10:  # 0-1 principle sanity check (build-time, cheap)
        for bits in range(1 << n):
            v = [(bits >> i) & 1 for i in range(n)]
            for a, b in pairs:
                if v[a] > v[b]:
                    v[a], v[b] = v[b], v[a]
            assert v == sorted(v), "sorting network generation bug"
    return tuple(pairs)


# ----------------------------- Pallas kernels ------------------------------

def matmul_kernel(x_ref, w_ref, o_ref):
    # One node tile of the projection h = x @ W (MXU).
    o_ref[...] = jnp.dot(x_ref[...], w_ref[...],
                         preferred_element_type=jnp.float32)


def median_kernel(idx_ref, deg_ref, h_ref, bias_ref, *rest,
                  K, tn, apply_relu, project, pairs):
    """Neighbor-median aggregation + bias (+ ReLU), optionally fused with the
    next layer's dense projection.

    idx_ref : SMEM int32 [n_p * K]   flattened neighbor indices (scalar prefetch)
    deg_ref : VMEM f32  (tn, 1)      per-node valid-neighbor count
    h_ref   : VMEM f32  (n_tot, Fp)  ALL projected node features (resident)
    bias_ref: VMEM f32  (1, Fp)
    rest    : (w_ref, o_ref, msg_scratch, med_scratch) if project
              else (o_ref, msg_scratch)

    Median: mask invalid slots to +BIG, run a Batcher sorting network along the
    K slots (min/max compare-exchanges on (8, Fp) vregs), then pick the
    lower-middle rank floor((deg-1)/2)  (torch.median convention).
    """
    if project:
        w_ref, o_ref, msg_ref, med_ref = rest
    else:
        o_ref, msg_ref = rest
        w_ref = med_ref = None

    pid = pl.program_id(0)
    bias = bias_ref[...]                            # [1, Fp] (hoisted)
    BIG = jnp.float32(3.0e38)

    @pl.loop(0, tn // 8)
    def _(c):
        r0 = pl.multiple_of(c * 8, 8)               # 8-row chunk inside the tile
        base = (pid * tn + r0) * K

        # --- in-kernel gather: 8*K rows from VMEM-resident h into a tiny scratch
        for rr in range(8):                         # static
            row_base = base + rr * K
            for k in range(K):                      # static
                nbr = idx_ref[row_base + k]         # SMEM scalar read
                msg_ref[k, pl.ds(rr, 1), :] = h_ref[pl.ds(nbr, 1), :]

        deg = deg_ref[pl.ds(r0, 8), :]              # [8, 1]
        rank = jnp.floor((deg - 1.0) * 0.5)         # lower-middle rank

        # mask invalid slots (slot k valid iff k < deg) to +BIG
        vals = [jnp.where(deg > jnp.float32(k), msg_ref[k, :, :], BIG)
                for k in range(K)]                  # K x [8, Fp]

        # Batcher odd-even sorting network along the K slots
        for a, b in pairs:                          # static comparator list
            lo = jnp.minimum(vals[a], vals[b])
            hi = jnp.maximum(vals[a], vals[b])
            vals[a], vals[b] = lo, hi

        # rank select (exactly one slot matches for deg >= 1; none for padding)
        out = jnp.zeros_like(vals[0])
        for k in range(K):
            out = out + jnp.where(rank == jnp.float32(k), vals[k], 0.0)

        out = out + bias
        if apply_relu:
            out = jnp.maximum(out, 0.0)
        if project:
            med_ref[pl.ds(r0, 8), :] = out
        else:
            o_ref[pl.ds(r0, 8), :] = out

    if project:
        # Fused next-layer projection: aggregated activations never hit HBM
        # before the matmul.
        o_ref[...] = jnp.dot(med_ref[...], w_ref[...],
                             preferred_element_type=jnp.float32)


# ------------------------------ layer wrappers ------------------------------

def pallas_matmul(x, w, *, tn):
    """h = x @ W, tiled over (pre-padded) node rows.  The contraction dim keeps
    its true size (full-array exception), the output dim is lane-dense."""
    n, fin = x.shape
    fout = w.shape[1]
    return pl.pallas_call(
        matmul_kernel,
        out_shape=jax.ShapeDtypeStruct((n, fout), jnp.float32),
        grid=(n // tn,),
        in_specs=[pl.BlockSpec((tn, fin), lambda i: (i, 0)),
                  pl.BlockSpec((fin, fout), lambda i: (0, 0))],
        out_specs=pl.BlockSpec((tn, fout), lambda i: (i, 0)),
        compiler_params=pltpu.CompilerParams(
            dimension_semantics=("parallel",),
            vmem_limit_bytes=vmem_limit_bytes()),
    )(x, w)


def pallas_median(idx_flat, deg, h, bias, w_next, *, K, tn, apply_relu, pairs):
    """Masked neighbor-median + bias (+ReLU), optionally fused with the next
    dense projection.  Neighbor rows are gathered in-kernel from h, which is
    kept resident in VMEM via a constant-index full-array block."""
    n_p = deg.shape[0]
    n_tot, fp = h.shape
    project = w_next is not None
    fout = w_next.shape[1] if project else fp

    kern = functools.partial(median_kernel, K=K, tn=tn, apply_relu=apply_relu,
                             project=project, pairs=pairs)

    in_specs = [
        pl.BlockSpec((tn, 1), lambda i, idx: (i, 0)),        # deg
        pl.BlockSpec((n_tot, fp), lambda i, idx: (0, 0)),    # h, VMEM resident
        pl.BlockSpec((1, fp), lambda i, idx: (0, 0)),        # bias
    ]
    args = [deg, h, bias]
    scratch = [pltpu.VMEM((K, 8, fp), jnp.float32)]          # per-chunk messages
    if project:
        in_specs.append(pl.BlockSpec((fp, fout), lambda i, idx: (0, 0)))
        args.append(w_next)
        scratch.append(pltpu.VMEM((tn, fp), jnp.float32))    # aggregated tile

    return pl.pallas_call(
        kern,
        out_shape=jax.ShapeDtypeStruct((n_p, fout), jnp.float32),
        grid_spec=pltpu.PrefetchScalarGridSpec(
            num_scalar_prefetch=1,
            grid=(n_p // tn,),
            in_specs=in_specs,
            out_specs=pl.BlockSpec((tn, fout), lambda i, idx: (i, 0)),
            scratch_shapes=scratch),
        compiler_params=pltpu.CompilerParams(
            dimension_semantics=("parallel",),
            vmem_limit_bytes=vmem_limit_bytes()),
    )(idx_flat, *args)


def median_gcn_forward(x, nbr_idx, deg, params):
    """MedianGCN(in, out, hids=[H], acts=['relu'], bn=False) in eval mode."""
    (w1, b1), (w2, b2) = params
    n, f_in = x.shape
    K = nbr_idx.shape[1]
    hid = w1.shape[1]
    f_out = w2.shape[1]

    # Lane-dense feature padding (outputs only) and node-tile padding.  Padded
    # rows/columns are zero and are never gathered by real nodes.
    hid_p = round_up(hid, 128)
    fout_p = round_up(f_out, 128)
    tn = pick_tn(n)
    n_p = round_up(n, tn)

    x_p = jnp.pad(x, ((0, n_p - n), (0, 0))).astype(jnp.float32)
    w1_p = jnp.pad(w1, ((0, 0), (0, hid_p - hid)))
    b1_p = jnp.pad(b1, (0, hid_p - hid)).reshape(1, hid_p)
    w2_p = jnp.pad(w2, ((0, hid_p - hid), (0, fout_p - f_out)))
    b2_p = jnp.pad(b2, (0, fout_p - f_out)).reshape(1, fout_p)

    idx_flat = jnp.pad(nbr_idx, ((0, n_p - n), (0, 0))).reshape(-1).astype(jnp.int32)
    deg_p = jnp.pad(deg.astype(jnp.float32), (0, n_p - n)).reshape(n_p, 1)

    pairs = sorting_network(K)

    # Layer 1 projection (MXU).
    h1 = pallas_matmul(x_p, w1_p, tn=tn)                               # [n_p, hid_p]
    # Fused: h2 = relu(median(nbrs(h1)) + b1) @ W2   (Dropout = identity, eval)
    h2 = pallas_median(idx_flat, deg_p, h1, b1_p, w2_p,
                       K=K, tn=tn, apply_relu=True, pairs=pairs)       # [n_p, fout_p]
    # Layer 2 aggregation: out = median(nbrs(h2)) + b2
    out_p = pallas_median(idx_flat, deg_p, h2, b2_p, None,
                          K=K, tn=tn, apply_relu=False, pairs=pairs)
    return out_p[:n, :f_out]


# ------------------------------ graph helpers -------------------------------

def build_padded_neighbors(edge_index, num_nodes):
    """edge_index[0]=src, edge_index[1]=dst; node dst aggregates from src.
    Self-loops appended (MedianConv add_self_loops=True).  Returns
    idx [N, K] int32 (valid slots first) and deg [N] float32."""
    src, dst = np.asarray(edge_index)
    nbrs = [[i] for i in range(num_nodes)]
    for s, d in zip(src, dst):
        nbrs[int(d)].append(int(s))
    K = max(len(ne) for ne in nbrs)
    idx = np.zeros((num_nodes, K), dtype=np.int32)
    deg = np.zeros((num_nodes,), dtype=np.float32)
    for i, ne in enumerate(nbrs):
        idx[i, :len(ne)] = ne
        deg[i] = len(ne)
    return jnp.asarray(idx), jnp.asarray(deg)


def glorot(key, fan_in, fan_out):
    limit = float(np.sqrt(6.0 / (fan_in + fan_out)))
    return jax.random.uniform(key, (fan_in, fan_out), jnp.float32, -limit, limit)


def reference_forward(x, nbr_idx, deg, params):
    """Pure numpy reference (torch.median lower-middle convention)."""
    x = np.asarray(x)
    nbr_idx = np.asarray(nbr_idx)
    deg = np.asarray(deg).astype(np.int64)
    K = nbr_idx.shape[1]
    valid = np.arange(K)[None, :] < deg[:, None]
    big = np.float32(3.0e38)

    def conv(h, w, b, relu):
        z = h @ np.asarray(w)
        msgs = z[nbr_idx]                                    # [N, K, F]
        vals = np.where(valid[..., None], msgs, big)
        vals = np.sort(vals, axis=1)
        pick = (deg - 1) // 2                                # lower-middle
        med = np.take_along_axis(vals, pick[:, None, None], axis=1)[:, 0, :]
        out = med + np.asarray(b)
        return np.maximum(out, 0.0) if relu else out

    (w1, b1), (w2, b2) = params
    h = conv(x, w1, b1, True)
    return conv(h, w2, b2, False)


# ---------------------------------- main ------------------------------------

if __name__ == "__main__":
    N, F_IN, HID, F_OUT = 32, 32, 16, 8

    key = jax.random.PRNGKey(0)
    kx, kw1, kw2, kb1, kb2 = jax.random.split(key, 5)

    x = jax.random.normal(kx, (N, F_IN), jnp.float32)

    # Deterministic small graph: undirected ring + 4 undirected chords.
    src = list(range(N)) + [(i + 1) % N for i in range(N)]
    dst = [(i + 1) % N for i in range(N)] + list(range(N))
    for i in range(0, N // 2, 4):
        j = (i + N // 2) % N
        src += [i, j]
        dst += [j, i]
    edge_index = np.array([src, dst], dtype=np.int32)

    nbr_idx, deg = build_padded_neighbors(edge_index, N)

    # MedianConv.lin uses glorot weights (no lin bias); the layer bias is a
    # separate parameter — use small random values to exercise the bias path.
    w1 = glorot(kw1, F_IN, HID)
    b1 = 0.1 * jax.random.normal(kb1, (HID,), jnp.float32)
    w2 = glorot(kw2, HID, F_OUT)
    b2 = 0.1 * jax.random.normal(kb2, (F_OUT,), jnp.float32)
    params = ((w1, b1), (w2, b2))

    out = median_gcn_forward(x, nbr_idx, deg, params)
    out = jax.block_until_ready(out)
    assert out.shape == (N, F_OUT) and out.dtype == jnp.float32

    ref = reference_forward(x, nbr_idx, deg, params)
    err = float(np.max(np.abs(np.asarray(out) - ref)))
    assert err < 1e-2, f"max abs error vs reference: {err}"

    print("KERNEL_OK")
</pallas_src>

<mosaic_0001>
module attributes {stable_mosaic.version = 11 : i64} {
  func.func @matmul_kernel(%arg0: i32, %arg1: memref<16x32xf32, #tpu.memory_space<vmem>>, %arg2: memref<32x128xf32, #tpu.memory_space<vmem>>, %arg3: memref<16x128xf32, #tpu.memory_space<vmem>>) attributes {dimension_semantics = [#tpu.dimension_semantics<parallel>], iteration_bounds = array<i64: 2>, scalar_prefetch = 0 : i64, scratch_operands = 0 : i64, tpu.core_type = #tpu.core_type<tc>, window_params = [{transform_indices = @transform_0, window_bounds = array<i64: 16, 32>}, {pipeline_mode = #tpu.pipeline_mode<synchronous>, transform_indices = @transform_1, window_bounds = array<i64: 32, 128>}, {transform_indices = @transform_2, window_bounds = array<i64: 16, 128>}]} {
    %c0 = arith.constant 0 : index
    %c0_0 = arith.constant 0 : index
    %0 = vector.load %arg1[%c0, %c0_0] : memref<16x32xf32, #tpu.memory_space<vmem>>, vector<16x32xf32>
    %c0_1 = arith.constant 0 : index
    %c0_2 = arith.constant 0 : index
    %1 = vector.load %arg2[%c0_1, %c0_2] : memref<32x128xf32, #tpu.memory_space<vmem>>, vector<32x128xf32>
    %cst = arith.constant dense<0.000000e+00> : vector<16x128xf32>
    %2 = tpu.matmul %0, %1, %cst {dimension_numbers = #tpu.dot_dimension_numbers<[1], [0], [0], [1], [0, 0, 1, 1], [], []>} : vector<16x32xf32>, vector<32x128xf32>, vector<16x128xf32> -> vector<16x128xf32>
    %c0_3 = arith.constant 0 : index
    %c0_4 = arith.constant 0 : index
    %3 = vector.load %arg3[%c0_3, %c0_4] : memref<16x128xf32, #tpu.memory_space<vmem>>, vector<16x128xf32>
    tpu.vector_store %arg3[%c0_3, %c0_4], %2 {strides = array<i32>} : memref<16x128xf32, #tpu.memory_space<vmem>>, vector<16x128xf32>,
    return
  }
  func.func @transform_0(%arg0: i32) -> (i32, i32) {
    %c0_i32 = arith.constant 0 : i32
    %c0_i32_0 = arith.constant 0 : i32
    return %arg0, %c0_i32 : i32, i32
  }
  func.func @transform_1(%arg0: i32) -> (i32, i32) {
    %c0_i32 = arith.constant 0 : i32
    %c0_i32_0 = arith.constant 0 : i32
    %c0_i32_1 = arith.constant 0 : i32
    return %c0_i32, %c0_i32_0 : i32, i32
  }
  func.func @transform_2(%arg0: i32) -> (i32, i32) {
    %c0_i32 = arith.constant 0 : i32
    %c0_i32_0 = arith.constant 0 : i32
    return %arg0, %c0_i32 : i32, i32
  }
}

</mosaic_0001>

<bundles_post_ra>
// kernel: tpu_custom_call.1
= control target key start
LH: loop header
LB: loop body
LE: loop exit
PB: predicated region body
PF: predicated region fallthrough
CT: control target
= control target key end

     0   :  { %7 = vsyncpa [#allocation3], 0  ;;  %s701_s0 = inlined_call_operand.hbm [shape: f32[32,32], index: 0, kind: input, shape index: {}]   ;;  %s702_s1 = inlined_call_operand.hbm [shape: f32[32,128], index: 1, kind: input, shape index: {}]   ;;  %s703_s2 = inlined_call_operand.hbm [shape: f32[32,128], index: 2, kind: output, shape index: {}]  }
   0x1   :  { %9 = vsyncpa [#allocation3 + $0x1], 0 }
   0x2   :  { %10 = vsyncpa [#allocation6], 0 }
   0x3   :  { %11 = vsyncpa [#allocation4], 0 }
   0x4   :  { %13 = vsyncpa [#allocation4 + $0x1], 0  ;;  %s557_s9 = smov 0   ;;  %s559_s10 = smov 0  }
   0x5   :  { %s561_s11 = smov 0   ;;  %s563_s12 = smov 0  }
   0x6 LB: > { %s578_s13 = sadd.s32 4294967295, %s535_s12   ;;  %s320_s14 = sadd.s32 4294967294, %s535_s12   ;;  %s535_s12 = sphi %s563_s12, %s713_s12   ;;  %s531_s11 = sphi %s561_s11, %s712_s11   ;;  %s527_s10 = sphi %s559_s10, %s711_s10   ;;  %s523_s9 = sphi %s557_s9, %s710_s9  }
   0x7   : > { %p39_p0 = scmp.ne.s32.totalorder %s527_s10, %s523_s9  ;;  %p40_p1 = scmp.eq.s32.totalorder %s578_s13, 0 }
   0x8   : > { %p84_p2 = scmp.eq.s32.totalorder %s578_s13, 1  ;;  %p90_p3 = scmp.eq.s32.totalorder %s320_s14, 1 }
   0x9   : > { %p587_p4 = por %p40_p1, %p39_p0  ;;  %p321_p5 = scmp.ge.s32.totalorder %s535_s12, 1 }
   0xa   : > { %p592_p6 = por %p90_p3, %p39_p0  ;;  %p97_p7 = scmp.lt.s32.totalorder %s535_s12, 3 }
   0xb   : > { %s108_s19 = sshll.u32 %s702_s1, 4  ;;  %s537_s21 = smov [#allocation5]   ;;  %s109_s19 = int_to_ptr.hbm [resolvable:$true] %s108_s19 }
   0xc   : > { %p600_p8 = pnand %p321_p5, %p97_p7  ;;  %s110_s22 = sshll.u32 %s537_s21, 4  ;;  %s111_s22 = int_to_ptr.vmem [resolvable:$true] %s110_s22 }
   0xd   : > { %s610_s23 = sadd.s32 1, %s535_s12   ;;  %s538_s24 = smov 128  }
   0xe   : > { %p352_p9 = pneg %p600_p8  ;;  %s539_s25 = smov 8  }
   0xf   : > { %s23_s26 = ssub.s32 %s535_s12, %s610_s23  ;;  %s26_s27 = sadd.s32 1, %s531_s11 }
  0x10   : > { %p353_p10 = pnand %p352_p9, %p40_p1  ;;  %p24_p12 = scmp.eq.s32.totalorder %s23_s26, 0 }
  0x11   : > { %p33_p13 = scmp.ne.s32.totalorder %s531_s11, %s527_s10  ;;  %p34_p0 = scmp.eq.s32.totalorder %s535_s12, 0 }
  0x12   : > { %355 = dma.hbm_to_vmem [thread:$0]  (!%p353_p10), %s109_s19, 512, %s111_s22, [#allocation6], %s538_s24, %s538_s24, %s539_s25  }
  0x13   : > { %s622_s28 = scalar_select %p24_p12, %s531_s11, %s26_s27  }
  0x14   : > { %p626_p3 = por %p84_p2, %p33_p13  ;;  %p365_p5 = scmp.lt.s32.totalorder %s535_s12, 2 }
  0x15   : > { %s124_s30 = sand.u32 1, %s531_s11   ;;  %s338_s3 = sshll.u32 %s535_s12, 4 }
  0x16   : > { %p35_p7 = por %p34_p0, %p33_p13  ;;  %s324_s4 = sshll.u32 %s124_s30, 4 }
  0x17   : > { %s133_s7 = scalar_lea.hbm %s701_s0, %s338_s3  ;;  %s128_s14 = scalar_lea.vmem [#allocation2], %s324_s4 }
  0x18   : > { %s134_s8 = sshll.u32 %s133_s7, 4  ;;  %s136_s17 = sshll.u32 %s128_s14, 4  ;;  %s135_s8 = int_to_ptr.hbm [resolvable:$true] %s134_s8  ;;  %s137_s17 = int_to_ptr.vmem [resolvable:$true] %s136_s17 }
  0x19   : > { %p636_p9 = pnand %p365_p5, %p35_p7  ;;  %s125_s19 = scalar_lea.sflag [#allocation3], %s124_s30 }
  0x1a   : > { %s435_s21 = sshra.s32 %s135_s8, 4  ;;  %s442_s3 = scalar_lea.hbm %s701_s0, 32  ;;  %s436_s21 = int_to_ptr.hbm [resolvable:$true] %s435_s21 }
  0x1b   : > { %s437_s22 = scalar_lea.hbm %s436_s21, 16  ;;  %p439_p10 = pneg %p636_p9 }
  0x1c   : > { %p438_p2 = scmp.ne.s32.totalorder %s436_s21, %s437_s22  ;;  %p443_p0 = scmp.lt.s32.totalorder %s436_s21, %s701_s0 }
  0x1d   : > { %p444_p5 = scmp.lt.s32.totalorder %s442_s3, %s437_s22 }
  0x1e   : > { %p440_p12 = pnand %p439_p10, %p438_p2 }
  0x1f   : > { %p445_p7 = por %p444_p5, %p443_p0 }
  0x20   : > { %p441_p13 = pneg %p440_p12 }
  0x22   : > { %p446_p11 = pnand %p445_p7, %p441_p13 }
  0x24   : > { %449 = shalt.err (!%p446_p11)
}
  0x25   : > { %359 = dma.hbm_to_vmem [thread:$0]  (!%p636_p9), %s135_s8, 256, %s137_s17, %s125_s19, %s538_s24, %s538_s24, %s539_s25  }
  0x26   : > { %148 = sbr.rel (%p600_p8) target bundleno = 185 (0xb9), region = 28  ;;  %s656_s30 = sand.u32 (!%p600_p8), 1, %s527_s10  }
  0x27   : > { %s328_s6 = sshll.u32 (!%p600_p8), %s656_s30, 4  ;;  %s151_s7 = scalar_lea.sflag (!%p600_p8), [#allocation3], %s656_s30 }
  0x28   : > { %s154_s14 = scalar_lea.vmem (!%p600_p8), [#allocation2], %s328_s6 }
  0x2b   : > { %510 = dma.done.wait (%p587_p4), %s151_s7, 256  }
  0x2c   : > { %512 = vsyncadd (%p587_p4), %s151_s7, 4294967040 }
  0x2d   : > { %514 = dma.done.wait (%p40_p1), [#allocation6], 512  }
  0x2e   : > { %516 = vsyncadd (%p40_p1), [#allocation6], 4294966784  ;;  %v188_v0 = vld [vmem:[#allocation5 + $0x18] sm:$0xff]  ;;  %v187_v1 = vld [vmem:[#allocation5 + $0x10] sm:$0xff]  ;;  %vm189_vm0 = vcmask 261120   ;;  %s339_s15 = sshll.u32 %s578_s13, 4 }
  0x2f   : > { %208 = vmatpush.msra.mxu0 %v188_v0  ;;  %340 = vmatpush.msra.mxu1 %v188_v0  ;;  %v186_v2 = vld [vmem:[#allocation5 + $0x8] sm:$0xff]  ;;  %v185_v3 = vld [vmem:[#allocation5] sm:$0xff]  ;;  %s233_s25 = scalar_lea.hbm %s703_s2, %s339_s15  ;;  %s180_s8 = scalar_lea.vmem [#allocation7], %s328_s6 }
  0x30   : > { %v183_v4 = vld [vmem:[%s154_s14] sm:$0xff]  ;;  %v184_v5 = vld [vmem:[%s154_s14 + $0x8] sm:$0xff]  ;;  %s234_s17 = sshll.u32 %s180_s8, 4  ;;  %s236_s18 = sshll.u32 %s233_s25, 4  ;;  %s235_s17 = int_to_ptr.vmem [resolvable:$true] %s234_s17  ;;  %s237_s18 = int_to_ptr.hbm [resolvable:$true] %s236_s18 }
  0x31   : > { %209 = vmatpush.msra.mxu0 %v187_v1  ;;  %341 = vmatpush.msra.mxu1 %v187_v1  ;;  %s222_s19 = scalar_lea.sflag [#allocation4], %s656_s30  ;;  %s479_s21 = sshra.s32 %s237_s18, 4  ;;  %s480_s21 = int_to_ptr.hbm [resolvable:$true] %s479_s21 }
  0x32   : > { %s481_s22 = scalar_lea.hbm %s480_s21, 16  ;;  %s485_s27 = scalar_lea.hbm %s703_s2, 32 }
  0x33   : > { %210 = vmatpush.msra.mxu0 %v186_v2  ;;  %342 = vmatpush.msra.mxu1 %v186_v2  ;;  %p482_p1 = scmp.ne.s32.totalorder %s480_s21, %s481_s22  ;;  %p486_p11 = scmp.lt.s32.totalorder %s480_s21, %s703_s2 }
  0x34   : > { %p487_p9 = scmp.lt.s32.totalorder %s485_s27, %s481_s22 }
  0x35   : > { %211 = vmatpush.msra.mxu0 %v185_v3  ;;  %343 = vmatpush.msra.mxu1 %v185_v3  ;;  %p483_p4 = pnand %p482_p1, %p626_p3 }
  0x36   : > { %331 = vmatmul.msk.f32.vlgmr.msra.gmra.mxu0 %vm189_vm0, %v183_v4  ;;  %332 = vmatmul.msk.f32.vlgmr.msra.gmra.mxu1 %vm189_vm0, %v184_v5  ;;  %p488_p2 = por %p487_p9, %p486_p11 }
  0x37   : > { %p484_p8 = pneg %p483_p4 }
  0x39   : > { %p489_p10 = pnand %p488_p2, %p484_p8 }
  0xb3   : > { %v213_v6 = vpop.f32.mrf.mxu0  ;;  %v216_v7 = vpop.f32.mrf.mxu1 }
  0xb4   : > { %219 = vst [vmem:[%s180_s8] sm:$0xff] %v213_v6 }
  0xb5   : > { %220 = vst [vmem:[%s180_s8 + $0x8] sm:$0xff] %v216_v7 }
  0xb6   : > { %492 = shalt.err (!%p489_p10)
}
  0xb7   : > { %s540_s5 = smov 128   ;;  %s541_s30 = smov 8  }
  0xb8   : > { %350 = dma.vmem_to_hbm [thread:$0]  (%p626_p3), %s235_s17, 256, %s237_s18, %s222_s19, %s540_s5, %s540_s5, %s541_s30  }
  0xb9 PF: > { %s251_s6 = sand.u32 1, %s523_s9   ;;  %p709_p12 = scmp.ge.s32.totalorder %s535_s12, 2 }
  0xba   : > { %s252_s7 = scalar_lea.sflag [#allocation4], %s251_s6 }
  0xbb   : > { %p361_p13 = pnand %p709_p12, %p592_p6 }
  0xbd   : > { %p362_p0 = pneg %p361_p13 }
  0xbf   : > { %518 = dma.done.wait (%p362_p0), %s252_s7, 256  }
  0xc0   : > { %520 = vsyncadd (%p362_p0), %s252_s7, 4294967040  ;;  %p16_p5 = scmp.ge.s32.totalorder %s610_s23, 4   ;;  %s710_s9 = smov %s527_s10 }
  0xc1   : > { %s711_s10 = smov %s531_s11  ;;  %s712_s11 = smov %s622_s28 }
  0xc2   : > { %s713_s12 = smov %s610_s23  ;;  %18 = sbr.rel (!%p16_p5) target bundleno = 6 (0x6), region = 77 }
  0xc7   :  { %258 = vsyncpa [#allocation3], 1 }
  0xc8   :  { %260 = vsyncpa [#allocation3 + $0x1], 1 }
  0xc9   :  { %261 = vsyncpa [#allocation6], 1 }
  0xca   :  { %262 = vsyncpa [#allocation4], 1 }
  0xcb   :  { %264 = vsyncpa [#allocation4 + $0x1], 1 }

</bundles_post_ra>
